<compile_context>
chip_gen: v7x
topology: tpu7x:2x2x1
jax: 0.10.0
libtpu: 0.0.40
codegen_flags: <defaults>
</compile_context>

<pallas_src>
import functools

import jax
import jax.numpy as jnp
from jax.experimental import pallas as pl
from jax.experimental.pallas import tpu as pltpu

_LANE = 128


def _cdiv(a, b):
    return -(-a // b)


def _round_up(a, b):
    return _cdiv(a, b) * b


def _sublane_multiple(dtype):
    # Second-minor layout multiple: 8 for 4-byte, 16 for 2-byte, 32 for 1-byte.
    itemsize = jnp.dtype(dtype).itemsize
    return 8 * max(1, 4 // itemsize)


def _vmem_budget():
    """(scoped VMEM limit, per-block byte target), generation aware."""
    try:
        cap = int(pltpu.get_tpu_info().vmem_capacity_bytes)
    except Exception:
        cap = 64 * 1024 * 1024                      # conservative (v7x-sized) fallback
    vmem_limit = min(cap // 2, 64 * 1024 * 1024)    # 32 MiB on v7x, 64 MiB on v5e/v6e
    block_bytes = min(8 * 1024 * 1024, vmem_limit // 8)  # 4 MiB v7x, 8 MiB v5e/v6e
    return vmem_limit, block_bytes


# ---------------------------------------------------------------------------
# Fused single-pass kernel: one (C, HW) slab per grid step.
# ---------------------------------------------------------------------------
def _fused_kernel(x_ref, w_ref, b_ref, o_ref):
    # x_ref: (C, HW) one batch slab (native dtype)
    # w_ref: (C, 1)  fc2 weight already divided by HW (f32)
    # b_ref: (1, 1)  fc2 bias (f32)
    x = x_ref[...]
    pooled = jnp.sum(x.astype(jnp.float32), axis=1, keepdims=True)            # (C, 1)
    logit = jnp.sum(pooled * w_ref[...], axis=0, keepdims=True) + b_ref[...]  # (1, 1)
    scale = jax.nn.sigmoid(logit)                                             # (1, 1) f32
    # Multiply in f32 (promotion), cast once to the output dtype.
    o_ref[...] = (x * scale).astype(o_ref.dtype)


# ---------------------------------------------------------------------------
# Fallback phase 1: logit_b = sum_c (w_c / HW) * sum_hw x[b, c, hw] + bias
# ---------------------------------------------------------------------------
def _pool_scale_kernel(x_ref, w_ref, b_ref, scale_ref, acc_ref, *, hw):
    # x_ref:     (C, tile_hw)  spatial tile of one batch element (native dtype)
    # acc_ref:   (C, 1)        f32 scratch: running per-channel sums
    ti = pl.program_id(1)
    nt = pl.num_programs(1)
    tile_hw = x_ref.shape[-1]

    @pl.when(ti == 0)
    def _():
        acc_ref[...] = jnp.zeros_like(acc_ref)

    def _accum(mask_tail):
        x = x_ref[...].astype(jnp.float32)
        if mask_tail:
            # Zero the lanes beyond the true spatial extent (undefined padding).
            pos = ti * tile_hw + jax.lax.broadcasted_iota(jnp.int32, x.shape, 1)
            x = jnp.where(pos < hw, x, 0.0)
        acc_ref[...] += jnp.sum(x, axis=1, keepdims=True)

    if hw % tile_hw != 0:
        # Only the tail tile pays the iota + compare + select cost.
        @pl.when(ti < nt - 1)
        def _():
            _accum(False)

        @pl.when(ti == nt - 1)
        def _():
            _accum(True)
    else:
        _accum(False)

    @pl.when(ti == nt - 1)
    def _():
        logit = jnp.sum(acc_ref[...] * w_ref[...], axis=0, keepdims=True) + b_ref[...]
        scale_ref[...] = jax.nn.sigmoid(logit)


# ---------------------------------------------------------------------------
# Fallback phase 2: out = x * scale[b]  (f32 scale, no padded copies)
# ---------------------------------------------------------------------------
def _apply_scale_kernel(scale_ref, x_ref, o_ref):
    # scale_ref: (B,) f32 in SMEM;  x_ref / o_ref: (C, tile_hw) blocks
    s = scale_ref[pl.program_id(0)]
    o_ref[...] = (x_ref[...] * s).astype(o_ref.dtype)


def cbam_ol(x, w, b, *, block_bytes=None, vmem_limit_bytes=None,
            donate_x=False, _force_two_pass=False):
    """CBAM_OL forward. x: (B, C, H, W); w: (1, C); b: (1,). Returns (B, C, H, W)."""
    B, C, H, W = x.shape
    HW = H * W
    itemsize = jnp.dtype(x.dtype).itemsize

    auto_limit, auto_block = _vmem_budget()
    vmem_limit = int(vmem_limit_bytes or auto_limit)
    block_bytes = int(block_bytes or auto_block)

    x_chw = x.reshape(B, C, HW)
    w_scaled = w.reshape(C, 1).astype(jnp.float32) / jnp.float32(HW)  # fold mean's 1/HW
    b2 = b.reshape(1, 1).astype(jnp.float32)

    # Real VMEM footprint incl. sublane/lane layout padding (matters for small C).
    c_pad = _round_up(C, _sublane_multiple(x.dtype))
    slab_vmem = c_pad * _round_up(HW, _LANE) * itemsize
    assert 4 * c_pad * _LANE * itemsize <= vmem_limit, (
        "gate_channels too large for single-channel-block tiling")
    # TODO(synk): add a C-tiling fallback for extremely large channel counts.

    # ------------------ Fused single pass (common case) ----------------------
    # Budget: 2x input + 2x output double buffers + ~2x working f32 copy.
    if (not _force_two_pass) and 6 * slab_vmem <= vmem_limit:
        out_chw = pl.pallas_call(
            _fused_kernel,
            out_shape=jax.ShapeDtypeStruct((B, C, HW), x.dtype),
            grid=(B,),
            in_specs=[
                pl.BlockSpec((pl.Squeezed(), C, HW), lambda bi: (bi, 0, 0)),
                pl.BlockSpec((C, 1), lambda bi: (0, 0)),
                pl.BlockSpec((1, 1), lambda bi: (0, 0)),
            ],
            out_specs=pl.BlockSpec((pl.Squeezed(), C, HW), lambda bi: (bi, 0, 0)),
            compiler_params=pltpu.CompilerParams(
                dimension_semantics=("parallel",),
                vmem_limit_bytes=vmem_limit,
            ),
            input_output_aliases=({0: 0} if donate_x else {}),
        )(x_chw, w_scaled, b2)
        return out_chw.reshape(B, C, H, W)

    # ------------------ Two-pass tiled fallback (oversized slabs) ------------
    max_hw = max(_LANE, (block_bytes // max(1, c_pad * itemsize)) // _LANE * _LANE)
    tile_hw = HW if HW <= max_hw else max_hw        # full extent, or a 128-multiple
    n_hw_tiles = _cdiv(HW, tile_hw)

    # Phase 1: per-batch attention scale (accumulator phased over the HW axis).
    scale = pl.pallas_call(
        functools.partial(_pool_scale_kernel, hw=HW),
        out_shape=jax.ShapeDtypeStruct((B, 1, 1), jnp.float32),
        grid=(B, n_hw_tiles),
        in_specs=[
            pl.BlockSpec((pl.Squeezed(), C, tile_hw), lambda bi, ti: (bi, 0, ti)),
            pl.BlockSpec((C, 1), lambda bi, ti: (0, 0)),
            pl.BlockSpec((1, 1), lambda bi, ti: (0, 0)),
        ],
        out_specs=pl.BlockSpec((pl.Squeezed(), 1, 1), lambda bi, ti: (bi, 0, 0)),
        scratch_shapes=[pltpu.VMEM((C, 1), jnp.float32)],
        compiler_params=pltpu.CompilerParams(
            dimension_semantics=("parallel", "arbitrary"),
            vmem_limit_bytes=vmem_limit,
        ),
    )(x_chw, w_scaled, b2)
    scale_vec = scale.reshape(B)
    # TODO(synk): for B == 1 on v7x, split the HW reduction over a leading
    # size-2 parallel axis so both TensorCores get Phase-1 work.

    # Phase 2: tiled elementwise scaling on the same (B, C, HW) view.
    # No jnp.pad / tail slice: the partial last spatial block is handled by
    # Pallas' masked tail stores, so ragged HW costs no extra HBM traffic.
    out_chw = pl.pallas_call(
        _apply_scale_kernel,
        out_shape=jax.ShapeDtypeStruct((B, C, HW), x.dtype),
        grid=(B, n_hw_tiles),
        in_specs=[
            pl.BlockSpec(memory_space=pltpu.MemorySpace.SMEM),   # per-batch scales
            pl.BlockSpec((pl.Squeezed(), C, tile_hw), lambda bi, ti: (bi, 0, ti)),
        ],
        out_specs=pl.BlockSpec((pl.Squeezed(), C, tile_hw), lambda bi, ti: (bi, 0, ti)),
        compiler_params=pltpu.CompilerParams(
            dimension_semantics=("parallel", "parallel"),
            vmem_limit_bytes=vmem_limit,
        ),
        input_output_aliases=({1: 0} if donate_x else {}),
    )(scale_vec, x_chw)
    return out_chw.reshape(B, C, H, W)


def _reference(x, w, b):
    # Pure-JAX reference matching the PyTorch forward.
    pooled = jnp.mean(x, axis=(2, 3))                    # (B, C)
    logit = pooled @ w.reshape(-1, 1) + b                # (B, 1)
    scale = jax.nn.sigmoid(logit)[:, :, None, None]      # (B, 1, 1, 1)
    return x * scale


if __name__ == "__main__":
    key = jax.random.PRNGKey(0)
    k_x, k_w, k_b, k_x2 = jax.random.split(key, 4)

    # Primary shape implied by the module.
    B, C, H, W = 2, 4, 16, 16
    x = jax.random.normal(k_x, (B, C, H, W), dtype=jnp.float32)

    # Deterministic init mimicking nn.Linear(C, 1) default (uniform in +-1/sqrt(C)).
    bound = 1.0 / jnp.sqrt(jnp.float32(C))
    w = jax.random.uniform(k_w, (1, C), minval=-bound, maxval=bound, dtype=jnp.float32)
    b = jax.random.uniform(k_b, (1,), minval=-bound, maxval=bound, dtype=jnp.float32)

    ref = _reference(x, w, b)

    # 1) Fused single-pass path (typical CBAM feature map: slab fits in VMEM).
    out = cbam_ol(x, w, b)
    jax.block_until_ready(out)
    assert out.shape == (B, C, H, W)
    assert jnp.allclose(out, ref, atol=1e-5, rtol=1e-5), "mismatch (fused path)"

    # 2) Two-pass fallback, evenly tiled (HW % tile_hw == 0, unmasked reduce).
    out_tp = cbam_ol(x, w, b, block_bytes=4096, _force_two_pass=True)
    jax.block_until_ready(out_tp)
    assert jnp.allclose(out_tp, ref, atol=1e-5, rtol=1e-5), "mismatch (two-pass even path)"

    # 3) Two-pass fallback on a ragged shape: multi-tile reduction with a masked
    #    tail tile plus a partial last spatial block in the scaling pass, all
    #    without padded copies.
    B2, C2, H2, W2 = 2, 4, 23, 23
    x2 = jax.random.normal(k_x2, (B2, C2, H2, W2), dtype=jnp.float32)
    out2 = cbam_ol(x2, w, b, block_bytes=4096, _force_two_pass=True)
    jax.block_until_ready(out2)
    ref2 = _reference(x2, w, b)
    assert out2.shape == (B2, C2, H2, W2)
    assert jnp.allclose(out2, ref2, atol=1e-5, rtol=1e-5), "mismatch (two-pass ragged path)"

    print("KERNEL_OK")
</pallas_src>

<mosaic_0001>
module attributes {stable_mosaic.version = 11 : i64} {
  func.func @_fused_kernel(%arg0: i32, %arg1: memref<1x4x256xf32, #tpu.memory_space<vmem>>, %arg2: memref<4x1xf32, #tpu.memory_space<vmem>>, %arg3: memref<1x1xf32, #tpu.memory_space<vmem>>, %arg4: memref<1x4x256xf32, #tpu.memory_space<vmem>>) attributes {dimension_semantics = [#tpu.dimension_semantics<parallel>], iteration_bounds = array<i64: 2>, scalar_prefetch = 0 : i64, scratch_operands = 0 : i64, tpu.core_type = #tpu.core_type<tc>, window_params = [{transform_indices = @transform_0, window_bounds = array<i64: 1, 4, 256>}, {pipeline_mode = #tpu.pipeline_mode<synchronous>, transform_indices = @transform_1, window_bounds = array<i64: 4, 1>}, {pipeline_mode = #tpu.pipeline_mode<synchronous>, transform_indices = @transform_2, window_bounds = array<i64: 1, 1>}, {transform_indices = @transform_3, window_bounds = array<i64: 1, 4, 256>}]} {
    %c0 = arith.constant 0 : index
    %c0_0 = arith.constant 0 : index
    %c0_1 = arith.constant 0 : index
    %0 = vector.load %arg1[%c0, %c0_0, %c0_1] : memref<1x4x256xf32, #tpu.memory_space<vmem>>, vector<1x4x256xf32>
    %1 = vector.shape_cast %0 : vector<1x4x256xf32> to vector<4x256xf32>
    %cst = arith.constant dense<0.000000e+00> : vector<4xf32>
    %2 = vector.multi_reduction <add>, %1, %cst [1] : vector<4x256xf32> to vector<4xf32>
    %3 = vector.shape_cast %2 : vector<4xf32> to vector<4x1xf32>
    %c0_2 = arith.constant 0 : index
    %c0_3 = arith.constant 0 : index
    %4 = vector.load %arg2[%c0_2, %c0_3] : memref<4x1xf32, #tpu.memory_space<vmem>>, vector<4x1xf32>
    %5 = arith.mulf %3, %4 : vector<4x1xf32>
    %cst_4 = arith.constant dense<0.000000e+00> : vector<1xf32>
    %6 = vector.multi_reduction <add>, %5, %cst_4 [0] : vector<4x1xf32> to vector<1xf32>
    %7 = vector.shape_cast %6 : vector<1xf32> to vector<1x1xf32>
    %c0_5 = arith.constant 0 : index
    %c0_6 = arith.constant 0 : index
    %8 = vector.load %arg3[%c0_5, %c0_6] : memref<1x1xf32, #tpu.memory_space<vmem>>, vector<1x1xf32>
    %9 = arith.addf %7, %8 : vector<1x1xf32>
    %10 = arith.negf %9 : vector<1x1xf32>
    %11 = math.exp %10 : vector<1x1xf32>
    %cst_7 = arith.constant 1.000000e+00 : f32
    %12 = vector.broadcast %cst_7 : f32 to vector<1x1xf32>
    %13 = arith.addf %12, %11 : vector<1x1xf32>
    %14 = arith.divf %12, %13 : vector<1x1xf32>
    %15 = vector.broadcast %14 : vector<1x1xf32> to vector<4x256xf32>
    %16 = arith.mulf %1, %15 : vector<4x256xf32>
    %c0_8 = arith.constant 0 : index
    %c0_9 = arith.constant 0 : index
    %c0_10 = arith.constant 0 : index
    %17 = vector.load %arg4[%c0_8, %c0_9, %c0_10] : memref<1x4x256xf32, #tpu.memory_space<vmem>>, vector<1x4x256xf32>
    %18 = vector.shape_cast %17 : vector<1x4x256xf32> to vector<4x256xf32>
    %19 = vector.shape_cast %16 : vector<4x256xf32> to vector<1x4x256xf32>
    tpu.vector_store %arg4[%c0_8, %c0_9, %c0_10], %19 {strides = array<i32>} : memref<1x4x256xf32, #tpu.memory_space<vmem>>, vector<1x4x256xf32>,
    return
  }
  func.func @transform_0(%arg0: i32) -> (i32, i32, i32) {
    %c0_i32 = arith.constant 0 : i32
    %c0_i32_0 = arith.constant 0 : i32
    %c0_i32_1 = arith.constant 0 : i32
    return %arg0, %c0_i32, %c0_i32_0 : i32, i32, i32
  }
  func.func @transform_1(%arg0: i32) -> (i32, i32) {
    %c0_i32 = arith.constant 0 : i32
    %c0_i32_0 = arith.constant 0 : i32
    %c0_i32_1 = arith.constant 0 : i32
    return %c0_i32, %c0_i32_0 : i32, i32
  }
  func.func @transform_2(%arg0: i32) -> (i32, i32) {
    %c0_i32 = arith.constant 0 : i32
    %c0_i32_0 = arith.constant 0 : i32
    %c0_i32_1 = arith.constant 0 : i32
    return %c0_i32, %c0_i32_0 : i32, i32
  }
  func.func @transform_3(%arg0: i32) -> (i32, i32, i32) {
    %c0_i32 = arith.constant 0 : i32
    %c0_i32_0 = arith.constant 0 : i32
    %c0_i32_1 = arith.constant 0 : i32
    return %arg0, %c0_i32, %c0_i32_0 : i32, i32, i32
  }
}

</mosaic_0001>

<bundles_post_ra>
// kernel: tpu_custom_call.1
= control target key start
LH: loop header
LB: loop body
LE: loop exit
PB: predicated region body
PF: predicated region fallthrough
CT: control target
= control target key end

     0   :  { %s669_s0 = inlined_call_operand.hbm [shape: f32[2,4,256], index: 0, kind: input, shape index: {}]   ;;  %s670_s1 = inlined_call_operand.vmem [shape: f32[4,1], index: 1, kind: input, shape index: {}]   ;;  %s671_s2 = inlined_call_operand.<no memory space> [shape: f32[1,1], index: 2, kind: input, shape index: {}]   ;;  %s672_s3 = inlined_call_operand.hbm [shape: f32[2,4,256], index: 3, kind: output, shape index: {}]  }
   0x1   :  { %v8_v0 = vstv %s671_s2 }
   0x2   :  { %9 = vst [vmem:[#allocation2] sm:$0x1] %v8_v0 }
   0x3   :  { %10 = vsyncpa [#allocation4], 0 }
   0x4   :  { %12 = vsyncpa [#allocation4 + $0x1], 0 }
   0x5   :  { %13 = vsyncpa [#allocation5], 0 }
   0x6   :  { %15 = vsyncpa [#allocation5 + $0x1], 0  ;;  %s501_s14 = smov 0   ;;  %s503_s15 = smov 0  }
   0x7   :  { %s505_s16 = smov 0   ;;  %s507_s17 = smov 0  }
   0x8 LB: > { %s522_s2 = sadd.s32 4294967295, %s474_s17   ;;  %s308_s18 = sadd.s32 4294967294, %s474_s17   ;;  %s474_s17 = sphi %s507_s17, %s687_s17   ;;  %s470_s16 = sphi %s505_s16, %s686_s16   ;;  %s466_s15 = sphi %s503_s15, %s685_s15   ;;  %s462_s14 = sphi %s501_s14, %s684_s14  }
   0x9   : > { %s526_s19 = sadd.s32 1, %s474_s17   ;;  %s28_s20 = sadd.s32 1, %s470_s16 }
   0xa   : > { %s25_s21 = ssub.s32 %s474_s17, %s526_s19  ;;  %p35_p0 = scmp.ne.s32.totalorder %s470_s16, %s466_s15 }
   0xb   : > { %p26_p1 = scmp.eq.s32.totalorder %s25_s21, 0  ;;  %p36_p2 = scmp.eq.s32.totalorder %s474_s17, 0 }
   0xc   : > { %p41_p3 = scmp.ne.s32.totalorder %s466_s15, %s462_s14  ;;  %p42_p4 = scmp.eq.s32.totalorder %s522_s2, 0 }
   0xd   : > { %s538_s22 = scalar_select %p26_p1, %s470_s16, %s28_s20  }
   0xe   : > { %p540_p5 = por %p36_p2, %p35_p0  ;;  %p544_p6 = por %p42_p4, %p41_p3 }
   0xf   : > { %p107_p7 = scmp.eq.s32.totalorder %s522_s2, 1  ;;  %p113_p8 = scmp.eq.s32.totalorder %s308_s18, 1 }
  0x10   : > { %p339_p10 = scmp.lt.s32.totalorder %s474_s17, 2  ;;  %s139_s27 = sand.u32 1, %s470_s16  }
  0x11   : > { %p551_p11 = por %p107_p7, %p35_p0  ;;  %p555_p12 = por %p113_p8, %p41_p3 }
  0x12   : > { %s323_s28 = sshll.u32 %s474_s17, 7  ;;  %s311_s29 = sshll.u32 %s139_s27, 3 }
  0x13   : > { %s676_s25 = scalar_select %p551_p11, 1, 0 }
  0x14   : > { %s677_s26 = scalar_select %p555_p12, 1, 0 }
  0x15   : > { %s564_s5 = scalar_lea.hbm %s669_s0, %s323_s28  ;;  %s143_s6 = scalar_lea.vmem [#allocation3], %s311_s29 }
  0x16   : > { %s151_s7 = sshll.u32 %s143_s6, 4  ;;  %p568_p13 = pnand %p339_p10, %p540_p5  ;;  %s572_s7 = int_to_ptr.vmem [resolvable:$true] %s151_s7 }
  0x17   : > { %s140_s9 = scalar_lea.sflag [#allocation4], %s139_s27  ;;  %s378_s10 = scalar_lea.hbm %s564_s5, 128 }
  0x18   : > { %p379_p2 = scmp.ne.s32.totalorder %s564_s5, %s378_s10  ;;  %p380_p3 = pneg %p568_p13 }
  0x19   : > { %s383_s13 = scalar_lea.hbm %s669_s0, 256  ;;  %p384_p5 = scmp.lt.u32.totalorder %s564_s5, %s669_s0 }
  0x1a   : > { %p381_p4 = pnand %p380_p3, %p379_p2  ;;  %p385_p8 = scmp.lt.u32.totalorder %s383_s13, %s378_s10 }
  0x1b   : > { %p387_p9 = scmp.lt.u32.totalorder %s378_s10, %s564_s5 }
  0x1c   : > { %p382_p7 = pneg %p381_p4  ;;  %p386_p10 = por %p385_p8, %p384_p5 }
  0x1e   : > { %p388_p0 = por %p387_p9, %p386_p10 }
  0x20   : > { %p389_p1 = pnand %p388_p0, %p382_p7 }
  0x22   : > { %392 = shalt.err (!%p389_p1)
}
  0x23   : > { %s393_s21 = scalar_lea.vmem %s572_s7, 128  ;;  %s476_s23 = smov [#allocation3]  }
  0x24   : > { %p394_p2 = scmp.ne.s32.totalorder %s572_s7, %s393_s21  ;;  %s398_s27 = sshll.u32 %s476_s23, 4  ;;  %s399_s27 = int_to_ptr.vmem [resolvable:$false] %s398_s27 }
  0x25   : > { %s400_s28 = scalar_lea.vmem %s399_s27, 256  ;;  %p401_p11 = scmp.lt.s32.totalorder %s572_s7, %s399_s27 }
  0x26   : > { %p396_p4 = pnand %p394_p2, %p380_p3  ;;  %p402_p5 = scmp.lt.s32.totalorder %s400_s28, %s393_s21 }
  0x28   : > { %p397_p12 = pneg %p396_p4  ;;  %p403_p8 = por %p402_p5, %p401_p11 }
  0x2a   : > { %p404_p9 = pnand %p403_p8, %p397_p12 }
  0x2c   : > { %407 = shalt.err (!%p404_p9)
}
  0x2d   : > { %334 = dma.hbm_to_vmem [thread:$0]  (!%p568_p13), %s564_s5, 128, %s572_s7, %s140_s9  }
  0x2e   : > { %p679_p0 = scmp.lt.s32.totalorder %s474_s17, 3  ;;  %p680_p1 = scmp.ge.s32.totalorder %s474_s17, 1 }
  0x30   : > { %p157_p3 = pnand %p680_p1, %p679_p0 }
  0x31   : > { %s606_s29 = sand.u32 (!%p157_p3), 1, %s466_s15  }
  0x32   : > { %160 = sbr.rel (%p157_p3) target bundleno = 316 (0x13c), region = 32  ;;  %s315_s30 = sshll.u32 (!%p157_p3), %s606_s29, 3 }
  0x33   : > { %s163_s4 = scalar_lea.sflag (!%p157_p3), [#allocation4], %s606_s29  ;;  %s166_s6 = scalar_lea.vmem (!%p157_p3), [#allocation3], %s315_s30 }
  0x39   : > { %453 = dma.done.wait (%p544_p6), %s163_s4, 128  }
  0x3a   : > { %455 = vsyncadd (%p544_p6), %s163_s4, 4294967168  ;;  %vm193_vm0 = vcmask 1043456   ;;  %v189_v1 = vld [vmem:[%s166_s6] sm:$0xff]  ;;  %vm201_vm1 = vcmask 3072   ;;  %v209_v15 = vld [vmem:[#allocation2] sm:$0x1] }
  0x3b   : > { %v191_v2 = vcombine.high %v189_v1, %v189_v1  ;;  %v194_v3 = vsel %vm193_vm0, %v189_v1, 0.0  ;;  %v199_v6 = vld [vmem:[%s670_s1] sm:$0xf]  ;;  %s324_s24 = sshll.u32 %s522_s2, 7  ;;  %s188_s8 = scalar_lea.vmem [#allocation6], %s315_s30 }
  0x3c   : > { %s238_s9 = sshll.u32 %s188_s8, 4  ;;  %s625_s13 = scalar_lea.hbm %s672_s3, %s324_s24  ;;  %s627_s9 = int_to_ptr.vmem [resolvable:$true] %s238_s9 }
  0x3d   : > { %v195_v4 = vsel %vm193_vm0, %v191_v2, 0.0  ;;  %s224_s18 = scalar_lea.sflag [#allocation5], %s606_s29  ;;  %s408_s20 = scalar_lea.vmem %s627_s9, 128 }
  0x3e   : > { %v196_v5 = vadd.f32 %v195_v4, %v194_v3  ;;  %p409_p6 = scmp.ne.s32.totalorder %s627_s9, %s408_s20  ;;  %p681_p11 = scmp.ne.s32.totalorder %s676_s25, 0 }
  0x3f   : > { %s477_s2 = smov [#allocation6]  }
  0x40   : > { %197 = vadd.xlane.f32.xlu0 %v196_v5  ;;  %p410_p12 = pnand %p409_p6, %p681_p11  ;;  %s412_s21 = sshll.u32 %s477_s2, 4  ;;  %s413_s21 = int_to_ptr.vmem [resolvable:$false] %s412_s21 }
  0x41   : > { %s414_s23 = scalar_lea.vmem %s413_s21, 256  ;;  %p415_p7 = scmp.lt.s32.totalorder %s627_s9, %s413_s21 }
  0x42   : > { %p411_p13 = pneg %p410_p12  ;;  %p416_p10 = scmp.lt.s32.totalorder %s414_s23, %s408_s20 }
  0x44   : > { %p417_p2 = por %p416_p10, %p415_p7 }
  0x46   : > { %p418_p4 = pnand %p417_p2, %p411_p13 }
  0xcd   : > { %v198_v7 = vpop.xlane.xlu0 %197 }
  0xce   : > { %v200_v8 = vmul.f32 %v199_v6, %v198_v7 }
  0xd0   : > { %v202_v9 = vsel %vm201_vm1, %v200_v8, 0.0 }
  0xd1   : > { %v203_v10 = vrot.slane %v202_v9, 4 }
  0xd3   : > { %v204_v11 = vadd.f32 %v203_v10, %v202_v9 }
  0xd5   : > { %v205_v12 = vrot.slane %v204_v11, 2 }
  0xd7   : > { %v206_v13 = vadd.f32 %v205_v12, %v204_v11 }
  0xd9   : > { %v207_v14 = vrot.slane %v206_v13, 1 }
  0xdb   : > { %v208_v16 = vadd.f32 %v207_v14, %v206_v13 }
  0xdd   : > { %v210_v17 = vadd.f32 %v209_v15, %v208_v16 }
  0xdf   : > { %v317_v18 = vmul.f32 -1.442695, %v210_v17 }
  0xe1   : > { %374 = vpow2.f32 %v317_v18 }
  0xeb   : > { %v375_v19 = vpop.eup %374 }
  0xec   : > { %v214_v20 = vadd.f32 1.0, %v375_v19 }
  0xee   : > { %376 = vrcp.f32 %v214_v20 }
  0xf8   : > { %v377_v21 = vpop.eup %376 }
  0xf9   : > { %325 = vpush %v377_v21 }
 0x12a   : > { %s326_s10 = spop %325 }
 0x12b   : > { %v219_v22 = vstv %s326_s10 }
 0x12c   : > { %v221_v23 = vmul.f32 %v219_v22, %v189_v1 }
 0x12e   : > { %222 = vst [vmem:[%s188_s8] sm:$0xff] %v221_v23 }
 0x12f   : > { %421 = shalt.err (!%p418_p4)
}
 0x130   : > { %s422_s27 = scalar_lea.hbm %s625_s13, 128  ;;  %s426_s30 = scalar_lea.hbm %s672_s3, 256 }
 0x131   : > { %p423_p5 = scmp.ne.s32.totalorder %s625_s13, %s422_s27  ;;  %p427_p0 = scmp.lt.u32.totalorder %s625_s13, %s672_s3 }
 0x132   : > { %p428_p1 = scmp.lt.u32.totalorder %s426_s30, %s422_s27  ;;  %p430_p6 = scmp.lt.u32.totalorder %s422_s27, %s625_s13 }
 0x133   : > { %p424_p8 = pnand %p423_p5, %p681_p11 }
 0x134   : > { %p429_p3 = por %p428_p1, %p427_p0 }
 0x135   : > { %p425_p9 = pneg %p424_p8 }
 0x136   : > { %p431_p12 = por %p430_p6, %p429_p3 }
 0x138   : > { %p432_p13 = pnand %p431_p12, %p425_p9 }
 0x13a   : > { %435 = shalt.err (!%p432_p13)
}
 0x13b   : > { %329 = dma.vmem_to_hbm [thread:$0]  (%p681_p11), %s627_s9, 128, %s625_s13, %s224_s18  }
 0x13c PF: > { %s250_s5 = sand.u32 1, %s462_s14   ;;  %p682_p7 = scmp.ne.s32.totalorder %s677_s26, 0 }
 0x13d   : > { %p683_p10 = scmp.ge.s32.totalorder %s474_s17, 2  ;;  %s251_s7 = scalar_lea.sflag [#allocation5], %s250_s5 }
 0x13f   : > { %p336_p2 = pnand %p683_p10, %p682_p7 }
 0x141   : > { %457 = dma.done.wait (!%p336_p2), %s251_s7, 128  }
 0x142   : > { %459 = vsyncadd (!%p336_p2), %s251_s7, 4294967168  ;;  %p18_p4 = scmp.ge.s32.totalorder %s526_s19, 4   ;;  %s684_s14 = smov %s466_s15 }
 0x143   : > { %s685_s15 = smov %s470_s16  ;;  %s686_s16 = smov %s538_s22 }
 0x144   : > { %s687_s17 = smov %s526_s19  ;;  %20 = sbr.rel (!%p18_p4) target bundleno = 8 (0x8), region = 77 }
 0x14b   :  { %256 = vsyncpa [#allocation4], 1 }
 0x14c   :  { %258 = vsyncpa [#allocation4 + $0x1], 1 }
 0x14d   :  { %259 = vsyncpa [#allocation5], 1 }
 0x14e   :  { %261 = vsyncpa [#allocation5 + $0x1], 1 }

</bundles_post_ra>
